<compile_context>
chip_gen: v7x
topology: tpu7x:2x2x1
jax: 0.10.0
libtpu: 0.0.40
codegen_flags: <defaults>
</compile_context>

<pallas_src>
import math

import jax
import jax.numpy as jnp
from jax.experimental import pallas as pl
from jax.experimental.pallas import tpu as pltpu

_MIB = 1024 * 1024


def _round_up(x, m):
    return ((x + m - 1) // m) * m


def _cdiv(a, b):
    return -(-a // b)


def _tpu_generation_info():
    """Return (vmem_capacity_bytes, tensorcores_per_chip, preferred N/K granularity)."""
    kind = ""
    try:
        kind = jax.devices()[0].device_kind.lower()
    except Exception:
        pass
    is_v7 = "v7" in kind
    is_v5 = "v5" in kind

    vmem = None
    try:
        info = pltpu.get_tpu_info()
        for attr in ("vmem_capacity_bytes", "vmem_size_bytes", "vmem_bytes"):
            val = getattr(info, attr, None)
            if val:
                vmem = int(val)
                break
    except Exception:
        pass
    if vmem is None:
        vmem = 64 * _MIB if is_v7 else 128 * _MIB

    num_tc = 2 if is_v7 else 1
    # v6e/v7x MXU is 2x256^2 -> prefer 256-multiples of N/K; v5e's 4x128^2 MXU
    # is already saturated at 128 multiples.
    nk_gran = 128 if is_v5 else 256
    return vmem, num_tc, nk_gran


def _balanced_tile(dim, cap, gran):
    """Largest tile <= cap that is a multiple of `gran` and minimizes padding."""
    dim_p = _round_up(max(int(dim), 1), gran)
    if dim_p <= cap:
        return dim_p
    n_blocks = _cdiv(dim_p, cap)
    return _round_up(_cdiv(dim_p, n_blocks), gran)


def _choose_nk_tiles(in_dim, out_dim, vmem_bytes, nk_gran):
    if vmem_bytes <= 64 * _MIB:          # v7x: 64 MiB physical VMEM
        tn_cap, tk_cap = 512, 1024
    else:                                # v5e/v6e: 128 MiB
        tn_cap, tk_cap = 512, 2048
    tn = _balanced_tile(out_dim, tn_cap, nk_gran if out_dim > 128 else 128)
    tk = _balanced_tile(in_dim, tk_cap, nk_gran if in_dim > 128 else 128)
    return tn, tk


def _choose_m_tile(batch, dtype):
    sub = 16 if jnp.dtype(dtype).itemsize == 2 else 8
    return _balanced_tile(batch, 512, sub), sub


# ---------------------------------------------------------------------------
# Kernels
# ---------------------------------------------------------------------------

def _linear_kernel_f32out(x_ref, w_ref, b_ref, o_ref):
    """f32 output: accumulate directly into the resident output block (no scratch)."""
    k = pl.program_id(2)

    @pl.when(k == 0)
    def _():
        o_ref[...] = jnp.zeros_like(o_ref)

    # x tile: (tm, tk); w tile: (tk, tn) -- pre-transposed NN layout, pure MXU.
    o_ref[...] += jnp.dot(x_ref[...], w_ref[...], preferred_element_type=jnp.float32)

    @pl.when(k == pl.num_programs(2) - 1)
    def _():
        o_ref[...] += b_ref[...]          # bias added once per output tile


def _linear_kernel_acc(x_ref, w_ref, b_ref, o_ref, acc_ref):
    """Sub-f32 output: f32 VMEM accumulator, single downcast in the epilogue."""
    k = pl.program_id(2)

    @pl.when(k == 0)
    def _():
        acc_ref[...] = jnp.zeros_like(acc_ref)

    acc_ref[...] += jnp.dot(x_ref[...], w_ref[...], preferred_element_type=jnp.float32)

    @pl.when(k == pl.num_programs(2) - 1)
    def _():
        o_ref[...] = (acc_ref[...] + b_ref[...].astype(jnp.float32)).astype(o_ref.dtype)


# ---------------------------------------------------------------------------
# Module wrapper
# ---------------------------------------------------------------------------

class PallasLinear:
    """Pallas TPU equivalent of Linear.forward (flatten -> x @ W.T + b).

    Parameters are prepared once at construction (transpose to (K, N) NN
    layout + zero-pad to tile multiples), so the per-call hot path is a
    single pallas_call plus an x pad / output slice.

    Note: x is cast to the parameter dtype (or `compute_dtype` if given);
    accumulation is always f32 on the MXU.
    """

    def __init__(self, weight, bias, compute_dtype=None):
        out_dim, in_dim = weight.shape
        assert bias.shape == (out_dim,)
        self.in_dim = in_dim
        self.out_dim = out_dim
        self.dtype = jnp.dtype(compute_dtype) if compute_dtype is not None else weight.dtype

        vmem_bytes, num_tc, nk_gran = _tpu_generation_info()
        self.vmem_bytes = vmem_bytes
        self.num_tc = num_tc

        # tn / tk depend only on the (static) parameter shapes -> fix them now.
        self.tn, self.tk = _choose_nk_tiles(in_dim, out_dim, vmem_bytes, nk_gran)
        Kp = _round_up(in_dim, self.tk)
        Np = _round_up(out_dim, self.tn)
        self.Kp, self.Np = Kp, Np

        # One-time transpose to (K, N) + one-time zero padding (zero rows/cols
        # contribute nothing to the dot product).
        w_t = jnp.asarray(weight, self.dtype).T                        # (in_dim, out_dim)
        self.w_kn = jnp.pad(w_t, ((0, Kp - in_dim), (0, Np - out_dim)))
        b = jnp.asarray(bias, self.dtype).reshape(1, out_dim)
        self.b_pad = jnp.pad(b, ((0, 0), (0, Np - out_dim)))

    def __call__(self, x):
        batch = x.shape[0]
        x_flat = jnp.asarray(x, self.dtype).reshape(batch, -1)   # torch .view(batch, -1)
        assert x_flat.shape[1] == self.in_dim, "flattened input dim mismatch"

        tm, sub = _choose_m_tile(batch, self.dtype)
        tn, tk = self.tn, self.tk
        Mp = _round_up(batch, tm)
        Kp, Np = self.Kp, self.Np

        # v7x has 2 TensorCores: if the parallel part of the grid is a single
        # tile, split it so both cores get work (no-op on single-TC v5e/v6e).
        if self.num_tc >= 2 and (Mp // tm) * (Np // tn) == 1:
            if tn % 256 == 0:
                tn //= 2
            elif tm >= 2 * sub and tm % (2 * sub) == 0:
                tm //= 2

        xp = x_flat
        if (Mp, Kp) != x_flat.shape:
            xp = jnp.pad(x_flat, ((0, Mp - batch), (0, Kp - self.in_dim)))

        grid = (Mp // tm, Np // tn, Kp // tk)

        out_dtype = self.dtype
        acc_in_out = (out_dtype == jnp.float32)
        itemsize = jnp.dtype(self.dtype).itemsize
        out_itemsize = jnp.dtype(out_dtype).itemsize

        # VMEM budget: double-buffered x/w/bias/out (+ f32 scratch if needed),
        # 2x headroom, capped per generation (~48 MiB on v7x, ~100 MiB else).
        working_set = 2 * (tm * tk * itemsize + tk * tn * itemsize
                           + tn * itemsize + tm * tn * out_itemsize)
        if not acc_in_out:
            working_set += tm * tn * 4
        gen_cap = 48 * _MIB if self.vmem_bytes <= 64 * _MIB else 100 * _MIB
        vmem_limit = int(min(gen_cap, max(8 * _MIB, 2 * working_set)))

        cost = pl.CostEstimate(
            flops=2 * Mp * Np * Kp,
            transcendentals=0,
            bytes_accessed=int((Mp * Kp + Kp * Np + Np) * itemsize
                               + Mp * Np * out_itemsize),
        )

        in_specs = [
            pl.BlockSpec((tm, tk), lambda i, j, k: (i, k)),   # x       (M, K)
            pl.BlockSpec((tk, tn), lambda i, j, k: (k, j)),   # weight  (K, N) NN layout
            pl.BlockSpec((1, tn), lambda i, j, k: (0, j)),    # bias
        ]
        out_spec = pl.BlockSpec((tm, tn), lambda i, j, k: (i, j))

        if acc_in_out:
            kernel, scratch = _linear_kernel_f32out, []
        else:
            kernel, scratch = _linear_kernel_acc, [pltpu.VMEM((tm, tn), jnp.float32)]

        y_padded = pl.pallas_call(
            kernel,
            out_shape=jax.ShapeDtypeStruct((Mp, Np), out_dtype),
            grid_spec=pltpu.PrefetchScalarGridSpec(
                num_scalar_prefetch=0,
                grid=grid,
                in_specs=in_specs,
                out_specs=out_spec,
                scratch_shapes=scratch,
            ),
            compiler_params=pltpu.CompilerParams(
                dimension_semantics=("parallel", "parallel", "arbitrary"),
                vmem_limit_bytes=vmem_limit,
            ),
            cost_estimate=cost,
        )(xp, self.w_kn, self.b_pad)

        return y_padded[:batch, :self.out_dim]


if __name__ == "__main__":
    # args = {'input_dim': 32, 'output_dim': 16, ...}; lr / weight_decay only
    # affect training, not the forward pass.
    # TODO(synk): batch_train (CrossEntropyLoss + Adam step) not implemented; forward only.
    input_dim = 32
    output_dim = 16
    batch = 2

    key = jax.random.PRNGKey(0)
    kx, kw, kb = jax.random.split(key, 3)

    # Deterministic init mimicking nn.Linear: U(-1/sqrt(in), 1/sqrt(in))
    bound = 1.0 / math.sqrt(input_dim)
    weight = jax.random.uniform(kw, (output_dim, input_dim), jnp.float32, -bound, bound)
    bias = jax.random.uniform(kb, (output_dim,), jnp.float32, -bound, bound)

    x = jax.random.normal(kx, (batch, input_dim), jnp.float32)

    linear = PallasLinear(weight, bias)     # one-time param prep (transpose + pad)
    y = linear(x)
    jax.block_until_ready(y)

    # Sanity check against plain JAX reference.
    y_ref = x.reshape(batch, -1) @ weight.T + bias
    assert y.shape == (batch, output_dim)
    assert jnp.allclose(y, y_ref, atol=1e-5, rtol=1e-5)

    print("KERNEL_OK")
</pallas_src>

<mosaic_0001>
module attributes {stable_mosaic.version = 11 : i64} {
  func.func @_linear_kernel_f32out(%arg0: i32, %arg1: i32, %arg2: i32, %arg3: memref<8x128xf32, #tpu.memory_space<vmem>>, %arg4: memref<128x128xf32, #tpu.memory_space<vmem>>, %arg5: memref<1x128xf32, #tpu.memory_space<vmem>>, %arg6: memref<8x128xf32, #tpu.memory_space<vmem>>) attributes {dimension_semantics = [#tpu.dimension_semantics<parallel>, #tpu.dimension_semantics<parallel>, #tpu.dimension_semantics<arbitrary>], iteration_bounds = array<i64: 1, 1, 1>, scalar_prefetch = 0 : i64, scratch_operands = 0 : i64, tpu.core_type = #tpu.core_type<tc>, window_params = [{transform_indices = @transform_0, window_bounds = array<i64: 8, 128>}, {transform_indices = @transform_1, window_bounds = array<i64: 128, 128>}, {transform_indices = @transform_2, window_bounds = array<i64: 1, 128>}, {transform_indices = @transform_3, window_bounds = array<i64: 8, 128>}]} {
    %c0_i32 = arith.constant 0 : i32
    %0 = arith.cmpi eq, %arg2, %c0_i32 : i32
    %1 = arith.extui %0 : i1 to i32
    %c0_i32_0 = arith.constant 0 : i32
    %2 = arith.cmpi ne, %1, %c0_i32_0 : i32
    scf.if %2 {
      %cst_10 = arith.constant 0.000000e+00 : f32
      %12 = vector.broadcast %cst_10 : f32 to vector<8x128xf32>
      %c0_11 = arith.constant 0 : index
      %c0_12 = arith.constant 0 : index
      %13 = vector.load %arg6[%c0_11, %c0_12] : memref<8x128xf32, #tpu.memory_space<vmem>>, vector<8x128xf32>
      tpu.vector_store %arg6[%c0_11, %c0_12], %12 {strides = array<i32>} : memref<8x128xf32, #tpu.memory_space<vmem>>, vector<8x128xf32>,
    } else {
    }
    %c0 = arith.constant 0 : index
    %c0_1 = arith.constant 0 : index
    %3 = vector.load %arg6[%c0, %c0_1] : memref<8x128xf32, #tpu.memory_space<vmem>>, vector<8x128xf32>
    %c0_2 = arith.constant 0 : index
    %c0_3 = arith.constant 0 : index
    %4 = vector.load %arg3[%c0_2, %c0_3] : memref<8x128xf32, #tpu.memory_space<vmem>>, vector<8x128xf32>
    %c0_4 = arith.constant 0 : index
    %c0_5 = arith.constant 0 : index
    %5 = vector.load %arg4[%c0_4, %c0_5] : memref<128x128xf32, #tpu.memory_space<vmem>>, vector<128x128xf32>
    %cst = arith.constant dense<0.000000e+00> : vector<8x128xf32>
    %6 = tpu.matmul %4, %5, %cst {dimension_numbers = #tpu.dot_dimension_numbers<[1], [0], [0], [1], [0, 0, 1, 1], [], []>} : vector<8x128xf32>, vector<128x128xf32>, vector<8x128xf32> -> vector<8x128xf32>
    %7 = arith.addf %3, %6 : vector<8x128xf32>
    %c0_6 = arith.constant 0 : index
    %c0_7 = arith.constant 0 : index
    %8 = vector.load %arg6[%c0_6, %c0_7] : memref<8x128xf32, #tpu.memory_space<vmem>>, vector<8x128xf32>
    tpu.vector_store %arg6[%c0_6, %c0_7], %7 {strides = array<i32>} : memref<8x128xf32, #tpu.memory_space<vmem>>, vector<8x128xf32>,
    %c0_i32_8 = arith.constant 0 : i32
    %9 = arith.cmpi eq, %arg2, %c0_i32_8 : i32
    %10 = arith.extui %9 : i1 to i32
    %c0_i32_9 = arith.constant 0 : i32
    %11 = arith.cmpi ne, %10, %c0_i32_9 : i32
    scf.if %11 {
      %c0_10 = arith.constant 0 : index
      %c0_11 = arith.constant 0 : index
      %12 = vector.load %arg6[%c0_10, %c0_11] : memref<8x128xf32, #tpu.memory_space<vmem>>, vector<8x128xf32>
      %c0_12 = arith.constant 0 : index
      %c0_13 = arith.constant 0 : index
      %13 = vector.load %arg5[%c0_12, %c0_13] : memref<1x128xf32, #tpu.memory_space<vmem>>, vector<1x128xf32>
      %14 = vector.broadcast %13 : vector<1x128xf32> to vector<8x128xf32>
      %15 = arith.addf %12, %14 : vector<8x128xf32>
      %c0_14 = arith.constant 0 : index
      %c0_15 = arith.constant 0 : index
      %16 = vector.load %arg6[%c0_14, %c0_15] : memref<8x128xf32, #tpu.memory_space<vmem>>, vector<8x128xf32>
      tpu.vector_store %arg6[%c0_14, %c0_15], %15 {strides = array<i32>} : memref<8x128xf32, #tpu.memory_space<vmem>>, vector<8x128xf32>,
    } else {
    }
    return
  }
  func.func @transform_0(%arg0: i32, %arg1: i32, %arg2: i32) -> (i32, i32) {
    %c0_i32 = arith.constant 0 : i32
    return %arg0, %arg2 : i32, i32
  }
  func.func @transform_1(%arg0: i32, %arg1: i32, %arg2: i32) -> (i32, i32) {
    %c0_i32 = arith.constant 0 : i32
    return %arg2, %arg1 : i32, i32
  }
  func.func @transform_2(%arg0: i32, %arg1: i32, %arg2: i32) -> (i32, i32) {
    %c0_i32 = arith.constant 0 : i32
    %c0_i32_0 = arith.constant 0 : i32
    return %c0_i32, %arg1 : i32, i32
  }
  func.func @transform_3(%arg0: i32, %arg1: i32, %arg2: i32) -> (i32, i32) {
    %c0_i32 = arith.constant 0 : i32
    return %arg0, %arg1 : i32, i32
  }
}

</mosaic_0001>

<bundles_post_ra>
// kernel: tpu_custom_call.1
= control target key start
LH: loop header
LB: loop body
LE: loop exit
PB: predicated region body
PF: predicated region fallthrough
CT: control target
= control target key end

     0   :  { %8 = vsyncpa [#allocation3], 0  ;;  %s396_s0 = inlined_call_operand.hbm [shape: f32[8,128], index: 0, kind: input, shape index: {}]   ;;  %s397_s1 = inlined_call_operand.hbm [shape: f32[128,128], index: 1, kind: input, shape index: {}]   ;;  %s398_s2 = inlined_call_operand.vmem [shape: f32[1,128], index: 2, kind: input, shape index: {}]   ;;  %s399_s3 = inlined_call_operand.hbm [shape: f32[8,128], index: 3, kind: output, shape index: {}]  }
   0x1   :  { %9 = vsyncpa [#allocation6], 0 }
   0x2   :  { %10 = vsyncpa [#allocation4], 0  ;;  %s322_s12 = smov [#allocation2]   ;;  %s323_s14 = smov [#allocation5]  }
   0x3   :  { %s17_s13 = sshll.u32 %s322_s12, 4  ;;  %s26_s15 = sshll.u32 %s323_s14, 4  ;;  %s18_s13 = int_to_ptr.vmem [resolvable:$true] %s17_s13  ;;  %s350_s15 = int_to_ptr.vmem [resolvable:$true] %s26_s15 }
   0x4   :  { %s250_s18 = scalar_lea.hbm %s396_s0, 128 }
   0x5   :  { %p251_p0 = scmp.ne.s32.totalorder %s396_s0, %s250_s18  ;;  %p254_p1 = scmp.lt.u32.totalorder %s250_s18, %s396_s0 }
   0x7   :  { %p256_p2 = pnand %p254_p1, %p251_p0 }
   0x9   :  { %259 = shalt.err (!%p256_p2)
}
   0xa   :  { %s260_s23 = scalar_lea.vmem %s18_s13, 128  ;;  %p265_p4 = scmp.lt.s32.totalorder %s18_s13, %s18_s13 }
   0xb   :  { %p261_p3 = scmp.ne.s32.totalorder %s18_s13, %s260_s23  ;;  %p266_p5 = scmp.lt.s32.totalorder %s260_s23, %s260_s23 }
   0xd   :  { %p267_p6 = por %p266_p5, %p265_p4 }
   0xf   :  { %p268_p7 = pnand %p267_p6, %p261_p3 }
  0x11   :  { %271 = shalt.err (!%p268_p7)
}
  0x12   :  { %20 = dma.hbm_to_vmem [thread:$0]  %s396_s0, 128, %s18_s13, [#allocation3]  }
  0x13   :  { %s272_s28 = scalar_lea.hbm %s397_s1, 2048 }
  0x14   :  { %p273_p8 = scmp.ne.s32.totalorder %s397_s1, %s272_s28  ;;  %p276_p9 = scmp.lt.u32.totalorder %s272_s28, %s397_s1 }
  0x16   :  { %p278_p10 = pnand %p276_p9, %p273_p8 }
  0x18   :  { %281 = shalt.err (!%p278_p10)
}
  0x19   :  { %s282_s6 = scalar_lea.vmem %s350_s15, 2048  ;;  %p287_p12 = scmp.lt.s32.totalorder %s350_s15, %s350_s15 }
  0x1a   :  { %p283_p11 = scmp.ne.s32.totalorder %s350_s15, %s282_s6  ;;  %p288_p13 = scmp.lt.s32.totalorder %s282_s6, %s282_s6 }
  0x1c   :  { %p289_p0 = por %p288_p13, %p287_p12 }
  0x1e   :  { %p290_p1 = pnand %p289_p0, %p283_p11 }
  0x20   :  { %293 = shalt.err (!%p290_p1)
}
  0x21   :  { %s324_s0 = smov 128   ;;  %s325_s7 = smov 8  }
  0x22   :  { %32 = dma.hbm_to_vmem [thread:$0]  %s397_s1, 2048, %s350_s15, [#allocation6], %s324_s0, %s324_s0, %s325_s7  }
  0x23   :  { %316 = dma.done.wait [#allocation3], 128  }
  0x24   :  { %317 = vsyncadd [#allocation3], 4294967168 }
  0x25   :  { %318 = dma.done.wait [#allocation6], 2048  }
  0x26   :  { %319 = vsyncadd [#allocation6], 4294965248  ;;  %v326_v0 = vmov 0.0|0.0   ;;  %vm327_vm0 = vmmov 0   ;;  %v328_v1 = vmov 0.0   ;;  %v48_v2 = vld [vmem:[#allocation5] sm:$0xff] }
  0x27   :  { %218 = vmatprep.subr.bf16.mxu0 %v326_v0  ;;  %215 = vmatprep.mubr.msk.f32.mxu0 %vm327_vm0, %v328_v1  ;;  %v49_v3 = vld [vmem:[#allocation5 + $0x8] sm:$0xff]  ;;  %v50_v4 = vld [vmem:[#allocation5 + $0x10] sm:$0xff]  ;;  %v51_v6 = vld [vmem:[#allocation5 + $0x18] sm:$0xff]  ;;  %s329_s11 = smov [#allocation7]  }
  0x28   :  { %v219_v5 = vpack.c.bf16 %v49_v3, %v48_v2  ;;  %v222_v7 = vpack.c.bf16 %v51_v6, %v50_v4  ;;  %v52_v8 = vld [vmem:[#allocation5 + $0x20] sm:$0xff]  ;;  %v53_v9 = vld [vmem:[#allocation5 + $0x28] sm:$0xff]  ;;  %v54_v11 = vld [vmem:[#allocation5 + $0x30] sm:$0xff]  ;;  %s155_s12 = sshll.u32 %s329_s11, 4  ;;  %s156_s12 = int_to_ptr.vmem [resolvable:$true] %s155_s12 }
  0x29   :  { %v225_v10 = vpack.c.bf16 %v53_v9, %v52_v8  ;;  %v55_v12 = vld [vmem:[#allocation5 + $0x38] sm:$0xff]  ;;  %v56_v14 = vld [vmem:[#allocation5 + $0x40] sm:$0xff]  ;;  %v57_v15 = vld [vmem:[#allocation5 + $0x48] sm:$0xff]  ;;  %s294_s13 = scalar_lea.vmem %s156_s12, 128  ;;  %p299_p3 = scmp.lt.s32.totalorder %s156_s12, %s156_s12 }
  0x2a   :  { %220 = vmatpush3.bf16.msra.mxu0 %v219_v5  ;;  %v228_v13 = vpack.c.bf16 %v55_v12, %v54_v11  ;;  %v231_v16 = vpack.c.bf16 %v57_v15, %v56_v14  ;;  %v58_v17 = vld [vmem:[#allocation5 + $0x50] sm:$0xff]  ;;  %v59_v18 = vld [vmem:[#allocation5 + $0x58] sm:$0xff]  ;;  %v60_v20 = vld [vmem:[#allocation5 + $0x60] sm:$0xff]  ;;  %p295_p2 = scmp.ne.s32.totalorder %s156_s12, %s294_s13  ;;  %p300_p4 = scmp.lt.s32.totalorder %s294_s13, %s294_s13 }
  0x2b   :  { %221 = vmatprep.subr.bf16.mxu0 %v326_v0  ;;  %v234_v19 = vpack.c.bf16 %v59_v18, %v58_v17  ;;  %v61_v21 = vld [vmem:[#allocation5 + $0x68] sm:$0xff]  ;;  %v62_v23 = vld [vmem:[#allocation5 + $0x70] sm:$0xff]  ;;  %v63_v24 = vld [vmem:[#allocation5 + $0x78] sm:$0xff] }
  0x2c   :  { %v237_v22 = vpack.c.bf16 %v61_v21, %v60_v20  ;;  %v240_v25 = vpack.c.bf16 %v63_v24, %v62_v23  ;;  %v47_v26 = vld [vmem:[#allocation2] sm:$0xff]  ;;  %p301_p5 = por %p300_p4, %p299_p3 }
  0x2d   :  { %v165_v28 = vld [vmem:[%s398_s2] ss:$0 sm:$0xff] }
  0x2e   :  { %223 = vmatpush3.bf16.msra.mxu0 %v222_v7  ;;  %p302_p6 = pnand %p301_p5, %p295_p2 }
  0x2f   :  { %224 = vmatprep.subr.bf16.mxu0 %v326_v0 }
  0x32   :  { %226 = vmatpush3.bf16.msra.mxu0 %v225_v10 }
  0x33   :  { %227 = vmatprep.subr.bf16.mxu0 %v326_v0 }
  0x36   :  { %229 = vmatpush3.bf16.msra.mxu0 %v228_v13 }
  0x37   :  { %230 = vmatprep.subr.bf16.mxu0 %v326_v0 }
  0x3a   :  { %232 = vmatpush3.bf16.msra.mxu0 %v231_v16 }
  0x3b   :  { %233 = vmatprep.subr.bf16.mxu0 %v326_v0 }
  0x3e   :  { %235 = vmatpush3.bf16.msra.mxu0 %v234_v19 }
  0x3f   :  { %236 = vmatprep.subr.bf16.mxu0 %v326_v0 }
  0x42   :  { %238 = vmatpush3.bf16.msra.mxu0 %v237_v22 }
  0x43   :  { %239 = vmatprep.subr.bf16.mxu0 %v326_v0 }
  0x46   :  { %241 = vmatpush3.bf16.msra.mxu0 %v240_v25 }
  0x49   :  { %216 = vmatmul.mubr.f32.vlgmr.msra.gmra.mrb[0].mxu0 %v47_v26 }
 0x11c   :  { %v130_v27 = vpop.f32.mrb[0].mxu0 }
 0x11d   :  { %v217_v29 = vpop.f32.mrb[1].mxu0  ;;  %v147_v30 = vadd.f32 %v165_v28, %v130_v27 }
 0x11f   :  { %148 = vst [vmem:[#allocation7] sm:$0xff] %v147_v30 }
 0x120   :  { %305 = shalt.err (!%p302_p6)
}
 0x121   :  { %s306_s16 = scalar_lea.hbm %s399_s3, 128 }
 0x122   :  { %p307_p7 = scmp.ne.s32.totalorder %s399_s3, %s306_s16  ;;  %p310_p8 = scmp.lt.u32.totalorder %s306_s16, %s399_s3 }
 0x124   :  { %p312_p9 = pnand %p310_p8, %p307_p7 }
 0x126   :  { %315 = shalt.err (!%p312_p9)
}
 0x127   :  { %158 = dma.vmem_to_hbm [thread:$0]  %s156_s12, 128, %s399_s3, [#allocation4]  }
 0x128   :  { %320 = dma.done.wait [#allocation4], 128  }
 0x129   :  { %321 = vsyncadd [#allocation4], 4294967168 }
 0x12a   :  { %162 = vsyncpa [#allocation3], 1 }
 0x12b   :  { %163 = vsyncpa [#allocation6], 1 }
 0x12c   :  { %164 = vsyncpa [#allocation4], 1 }

</bundles_post_ra>
